<compile_context>
chip_gen: v7x
topology: tpu7x:2x2x1
jax: 0.10.0
libtpu: 0.0.40
codegen_flags: <defaults>
</compile_context>

<pallas_src>
import jax
import jax.numpy as jnp
from jax.experimental import pallas as pl
from jax.experimental.pallas import tpu as pltpu

_LANE = 128
_DEFAULT_TB = 8192                      # review: 4-8K tiles amortize per-step overhead
_STREAM_VMEM_BUDGET = 8 * 1024 * 1024   # 3 inputs x 2 buffers, fits v5e's 16 MiB scoped default


# ----------------------------- small helpers ---------------------------------

def _sigmoid(x):
    # exp routes to the EUP; reciprocal kept exact (approx=False) so the result
    # matches a pure-JAX sigmoid within 1e-5.  Flip to approx=True (also EUP)
    # when downstream tolerance allows.
    return pl.reciprocal(1.0 + jnp.exp(-x), approx=False)


def _gather_cols(table, idx):
    # table: (d, n) value loaded from a VMEM-resident ref; idx: (tb,) int32.
    # Column gather -> lane-dense (d, tb) result, batch on lanes.
    return jnp.take(table, idx, axis=1, mode="promise_in_bounds")


def _vmem_capacity_bytes():
    # Generation-aware residency decision (v7x: 64 MiB/core vs 128 MiB on
    # v5e/v6e).  Conservative fallback if the query is unavailable.
    try:
        return int(pltpu.get_tpu_info().vmem_capacity_bytes)
    except Exception:
        return 64 * 1024 * 1024


def _tile_size(B, d, itemsize, tb_req):
    """Pick the batch tile (multiple of 128 lanes) and the padded batch size."""
    B128 = pl.cdiv(B, _LANE) * _LANE
    # 3 streamed inputs x 2 pipeline buffers per grid step must fit the budget.
    max_tb = max(_LANE, (_STREAM_VMEM_BUDGET // (3 * 2 * d * itemsize)) // _LANE * _LANE)
    tb = max(_LANE, (int(tb_req) // _LANE) * _LANE)
    tb = min(tb, max_tb)
    tb = min(tb, B128)
    # v7x: keep >= 2 grid steps so dimension_semantics=("parallel",) can put one
    # half of the batch on each TensorCore (a no-op on single-TC v5e/v6e).
    if B128 >= 2 * _LANE:
        tb = min(tb, max(_LANE, (B128 // 2) // _LANE * _LANE))
    B_pad = pl.cdiv(B, tb) * tb
    return tb, B_pad


# -------------------------------- kernels -------------------------------------

def _btl_fused_kernel(ut_ref, vt_ref, u_ref, i_ref, j_ref, o_ref):
    # ut_ref: (d, n_users), vt_ref: (d, n_items) — VMEM-resident for the whole
    # grid (constant index_map).  u/i/j_ref: (1, tb) int32.  o_ref: (1, tb) f32.
    ut = ut_ref[...]
    vt = vt_ref[...]
    u_emb = _gather_cols(ut, u_ref[0, :])          # (d, tb), batch on lanes
    i_emb = _gather_cols(vt, i_ref[0, :])
    j_emb = _gather_cols(vt, j_ref[0, :])
    prod = u_emb * (i_emb - j_emb)                 # native dtype (bf16 VPU on v6e/v7x)
    diff = jnp.sum(prod.astype(jnp.float32), axis=0, keepdims=True)   # f32 accum, (1, tb)
    o_ref[...] = _sigmoid(diff)


def _btl_streaming_kernel(u_ref, i_ref, j_ref, o_ref):
    # u/i/j_ref: (d, tb) pre-gathered tiles, batch on lanes.  o_ref: (1, tb) f32.
    prod = u_ref[...] * (i_ref[...] - j_ref[...])  # native dtype multiply/subtract
    diff = jnp.sum(prod.astype(jnp.float32), axis=0, keepdims=True)   # f32 accum
    o_ref[...] = _sigmoid(diff)


# ------------------ one-time fused-gather capability probe --------------------

_FUSED_GATHER_OK = None   # None = unknown; probed lazily (runs eagerly, cached)


def _probe_fused_gather():
    """Check once that an in-kernel vector gather lowers AND computes correctly
    on this jax/Mosaic build; otherwise the streamed fallback is used."""
    global _FUSED_GATHER_OK
    if _FUSED_GATHER_OK is not None:
        return _FUSED_GATHER_OK
    try:
        d, n, tbp = 16, 384, 256   # exercise multi-vreg lanes + multi-sublane table
        tab = (jnp.arange(d * n, dtype=jnp.float32) * 0.125).reshape(d, n)
        idx = ((jnp.arange(tbp, dtype=jnp.int32) * 7) % n).astype(jnp.int32)

        def probe_kernel(tab_ref, idx_ref, o_ref):
            o_ref[...] = _gather_cols(tab_ref[...], idx_ref[0, :])

        out = pl.pallas_call(
            probe_kernel,
            out_shape=jax.ShapeDtypeStruct((d, tbp), jnp.float32),
        )(tab, idx.reshape(1, tbp))
        out = jax.block_until_ready(out)
        _FUSED_GATHER_OK = bool(jnp.allclose(out, tab[:, idx]))
    except Exception:
        _FUSED_GATHER_OK = False
    return _FUSED_GATHER_OK


# ------------------------------ public forward --------------------------------

def matrix_factorization_forward(U, V, u, i, j, *, tb=_DEFAULT_TB, fuse_gather=None):
    """BTL forward: sigmoid(sum(U[u] * (V[i] - V[j]), axis=1)) -> (B,) float32."""
    global _FUSED_GATHER_OK

    n_users, d = U.shape
    n_items, _ = V.shape
    B = u.shape[0]
    emb_dtype = jnp.promote_types(U.dtype, V.dtype)
    itemsize = jnp.dtype(emb_dtype).itemsize

    tb, B_pad = _tile_size(B, d, itemsize, tb)
    grid = (B_pad // tb,)
    pad = B_pad - B

    # Padded tail rows gather valid row 0 and are sliced off at the end.
    u_p = jnp.pad(u.astype(jnp.int32), (0, pad))
    i_p = jnp.pad(i.astype(jnp.int32), (0, pad))
    j_p = jnp.pad(j.astype(jnp.int32), (0, pad))

    # Tables kept "batch-on-lanes": (d, n) so gathered tiles are lane dense and
    # the reduction is a cheap sublane reduction.  Transposing the *tables* is
    # O(n*d), negligible next to anything batch-sized.
    UT = U.T.astype(emb_dtype)
    VT = V.T.astype(emb_dtype)

    # --- decide whether the gather can be fused into the kernel --------------
    table_bytes = (n_users + n_items) * d * itemsize
    fused_vmem_need = (
        2 * table_bytes          # full-array table blocks (may be double-buffered)
        + 3 * 2 * tb * 4         # index blocks (double-buffered)
        + 2 * tb * 4             # output blocks
        + 8 * d * tb * 4         # gathered tiles + f32 intermediates (scratch)
    )
    fused_fits = fused_vmem_need <= _vmem_capacity_bytes() // 2   # leave headroom (v7x!)
    if fuse_gather is None:
        fuse_gather = fused_fits and _probe_fused_gather()

    if fuse_gather:
        vmem_limit = None
        if fused_vmem_need > (12 << 20):
            vmem_limit = int(min(fused_vmem_need + (8 << 20), 48 << 20))
        try:
            out = pl.pallas_call(
                _btl_fused_kernel,
                out_shape=jax.ShapeDtypeStruct((1, B_pad), jnp.float32),
                grid=grid,
                in_specs=[
                    # Tables: full-array blocks + constant index_map -> DMA'd once,
                    # resident in VMEM across the whole grid.
                    pl.BlockSpec((d, n_users), lambda b: (0, 0)),
                    pl.BlockSpec((d, n_items), lambda b: (0, 0)),
                    pl.BlockSpec((1, tb), lambda b: (0, b)),
                    pl.BlockSpec((1, tb), lambda b: (0, b)),
                    pl.BlockSpec((1, tb), lambda b: (0, b)),
                ],
                out_specs=pl.BlockSpec((1, tb), lambda b: (0, b)),
                compiler_params=pltpu.CompilerParams(
                    dimension_semantics=("parallel",),   # shard batch tiles over v7x's 2 TCs
                    vmem_limit_bytes=vmem_limit,
                ),
            )(UT, VT,
              u_p.reshape(1, B_pad), i_p.reshape(1, B_pad), j_p.reshape(1, B_pad))
            _FUSED_GATHER_OK = True
            return out[0, :B]
        except Exception:
            # This Mosaic build / shape combination can't lower the in-kernel
            # vector gather; remember that and use the streamed path below.
            # TODO(synk): per-row DMA gather (manual make_async_copy) once d is
            # large enough for >=512B row DMAs to beat the XLA-side gather.
            _FUSED_GATHER_OK = False

    # --- fallback: gather outside (single pass, no transpose), stream tiles ---
    # Column gather from the pre-transposed tables yields (d, B_pad) directly,
    # removing the read+write transpose pass of the previous version.
    u_emb = jnp.take(UT, u_p, axis=1)   # (d, B_pad)
    i_emb = jnp.take(VT, i_p, axis=1)
    j_emb = jnp.take(VT, j_p, axis=1)

    out = pl.pallas_call(
        _btl_streaming_kernel,
        out_shape=jax.ShapeDtypeStruct((1, B_pad), jnp.float32),
        grid=grid,
        in_specs=[
            pl.BlockSpec((d, tb), lambda b: (0, b)),
            pl.BlockSpec((d, tb), lambda b: (0, b)),
            pl.BlockSpec((d, tb), lambda b: (0, b)),
        ],
        out_specs=pl.BlockSpec((1, tb), lambda b: (0, b)),
        compiler_params=pltpu.CompilerParams(
            dimension_semantics=("parallel",),
            # Let XLA fuse the gather producers into the Pallas input pipeline.
            allow_input_fusion=[True, True, True],
        ),
    )(u_emb, i_emb, j_emb)
    return out[0, :B]


# ------------------------------ demo / self-check -----------------------------

if __name__ == "__main__":
    # Deterministic parameter init mirroring the PyTorch module:
    #   U = randn(n_users, d) / sqrt(d);  V = randn(n_items, d) / sqrt(d)
    n_users, n_items, d = 16, 32, 32
    batch = 8

    key = jax.random.PRNGKey(0)
    k_u, k_v, k_bu, k_bi, k_bj = jax.random.split(key, 5)

    scale = 1.0 / jnp.sqrt(jnp.float32(d))
    U = jax.random.normal(k_u, (n_users, d), dtype=jnp.float32) * scale
    V = jax.random.normal(k_v, (n_items, d), dtype=jnp.float32) * scale

    u_idx = jax.random.randint(k_bu, (batch,), 0, n_users, dtype=jnp.int32)
    i_idx = jax.random.randint(k_bi, (batch,), 0, n_items, dtype=jnp.int32)
    j_idx = jax.random.randint(k_bj, (batch,), 0, n_items, dtype=jnp.int32)

    out = matrix_factorization_forward(U, V, u_idx, i_idx, j_idx)
    out = jax.block_until_ready(out)

    # Pure-JAX reference check (same math as the PyTorch forward).
    ref = jax.nn.sigmoid(jnp.sum(U[u_idx] * (V[i_idx] - V[j_idx]), axis=1))
    assert out.shape == (batch,)
    assert out.dtype == jnp.float32
    assert jnp.allclose(out, ref, atol=1e-5, rtol=1e-5)

    print("KERNEL_OK")
</pallas_src>

<mosaic_0001>
module attributes {stable_mosaic.version = 11 : i64} {
  func.func @_btl_streaming_kernel(%arg0: i32, %arg1: memref<32x128xf32, #tpu.memory_space<vmem>>, %arg2: memref<32x128xf32, #tpu.memory_space<vmem>>, %arg3: memref<32x128xf32, #tpu.memory_space<vmem>>, %arg4: memref<1x128xf32, #tpu.memory_space<vmem>>) attributes {dimension_semantics = [#tpu.dimension_semantics<parallel>], iteration_bounds = array<i64: 1>, scalar_prefetch = 0 : i64, scratch_operands = 0 : i64, tpu.core_type = #tpu.core_type<tc>, window_params = [{transform_indices = @transform_0, window_bounds = array<i64: 32, 128>}, {transform_indices = @transform_1, window_bounds = array<i64: 32, 128>}, {transform_indices = @transform_2, window_bounds = array<i64: 32, 128>}, {transform_indices = @transform_3, window_bounds = array<i64: 1, 128>}]} {
    %c0 = arith.constant 0 : index
    %c0_0 = arith.constant 0 : index
    %0 = vector.load %arg1[%c0, %c0_0] : memref<32x128xf32, #tpu.memory_space<vmem>>, vector<32x128xf32>
    %c0_1 = arith.constant 0 : index
    %c0_2 = arith.constant 0 : index
    %1 = vector.load %arg2[%c0_1, %c0_2] : memref<32x128xf32, #tpu.memory_space<vmem>>, vector<32x128xf32>
    %c0_3 = arith.constant 0 : index
    %c0_4 = arith.constant 0 : index
    %2 = vector.load %arg3[%c0_3, %c0_4] : memref<32x128xf32, #tpu.memory_space<vmem>>, vector<32x128xf32>
    %3 = arith.subf %1, %2 : vector<32x128xf32>
    %4 = arith.mulf %0, %3 : vector<32x128xf32>
    %cst = arith.constant dense<0.000000e+00> : vector<128xf32>
    %5 = vector.multi_reduction <add>, %4, %cst [0] : vector<32x128xf32> to vector<128xf32>
    %6 = vector.shape_cast %5 : vector<128xf32> to vector<1x128xf32>
    %cst_5 = arith.constant 0.000000e+00 : f32
    %7 = vector.broadcast %cst_5 : f32 to vector<1x128xf32>
    %8 = arith.subf %7, %6 : vector<1x128xf32>
    %9 = math.exp %8 : vector<1x128xf32>
    %cst_6 = arith.constant 1.000000e+00 : f32
    %10 = vector.broadcast %cst_6 : f32 to vector<1x128xf32>
    %11 = arith.addf %10, %9 : vector<1x128xf32>
    %12 = tpu.reciprocal %11 : vector<1x128xf32> -> vector<1x128xf32>
    %c0_7 = arith.constant 0 : index
    %c0_8 = arith.constant 0 : index
    %13 = vector.load %arg4[%c0_7, %c0_8] : memref<1x128xf32, #tpu.memory_space<vmem>>, vector<1x128xf32>
    tpu.vector_store %arg4[%c0_7, %c0_8], %12 {strides = array<i32>} : memref<1x128xf32, #tpu.memory_space<vmem>>, vector<1x128xf32>,
    return
  }
  func.func @transform_0(%arg0: i32) -> (i32, i32) {
    %c0_i32 = arith.constant 0 : i32
    %c0_i32_0 = arith.constant 0 : i32
    return %c0_i32, %arg0 : i32, i32
  }
  func.func @transform_1(%arg0: i32) -> (i32, i32) {
    %c0_i32 = arith.constant 0 : i32
    %c0_i32_0 = arith.constant 0 : i32
    return %c0_i32, %arg0 : i32, i32
  }
  func.func @transform_2(%arg0: i32) -> (i32, i32) {
    %c0_i32 = arith.constant 0 : i32
    %c0_i32_0 = arith.constant 0 : i32
    return %c0_i32, %arg0 : i32, i32
  }
  func.func @transform_3(%arg0: i32) -> (i32, i32) {
    %c0_i32 = arith.constant 0 : i32
    %c0_i32_0 = arith.constant 0 : i32
    return %c0_i32, %arg0 : i32, i32
  }
}

</mosaic_0001>

<bundles_post_ra>
// kernel: tpu_custom_call.1
= control target key start
LH: loop header
LB: loop body
LE: loop exit
PB: predicated region body
PF: predicated region fallthrough
CT: control target
= control target key end

     0   :  { %8 = vsyncpa [#allocation3], 0  ;;  %s301_s0 = inlined_call_operand.hbm [shape: f32[32,128], index: 0, kind: input, shape index: {}]   ;;  %s302_s1 = inlined_call_operand.hbm [shape: f32[32,128], index: 1, kind: input, shape index: {}]   ;;  %s303_s2 = inlined_call_operand.hbm [shape: f32[32,128], index: 2, kind: input, shape index: {}]   ;;  %s304_s3 = inlined_call_operand.hbm [shape: f32[1,128], index: 3, kind: output, shape index: {}]  }
   0x1   :  { %9 = vsyncpa [#allocation6], 0 }
   0x2   :  { %10 = vsyncpa [#allocation4], 0  ;;  %s211_s12 = smov [#allocation5]   ;;  %s212_s14 = smov [#allocation2]  }
   0x3   :  { %s28_s13 = sshll.u32 %s211_s12, 4  ;;  %s16_s15 = sshll.u32 %s212_s14, 4  ;;  %s29_s13 = int_to_ptr.vmem [resolvable:$true] %s28_s13  ;;  %s237_s15 = int_to_ptr.vmem [resolvable:$true] %s16_s15 }
   0x4   :  { %s117_s18 = scalar_lea.hbm %s302_s1, 512 }
   0x5   :  { %p118_p0 = scmp.ne.s32.totalorder %s302_s1, %s117_s18  ;;  %p121_p1 = scmp.lt.u32.totalorder %s117_s18, %s302_s1 }
   0x7   :  { %p123_p2 = pnand %p121_p1, %p118_p0 }
   0x9   :  { %126 = shalt.err (!%p123_p2)
}
   0xa   :  { %s127_s23 = scalar_lea.vmem %s29_s13, 512  ;;  %p132_p4 = scmp.lt.s32.totalorder %s29_s13, %s29_s13 }
   0xb   :  { %p128_p3 = scmp.ne.s32.totalorder %s29_s13, %s127_s23  ;;  %p133_p5 = scmp.lt.s32.totalorder %s127_s23, %s127_s23 }
   0xd   :  { %p134_p6 = por %p133_p5, %p132_p4 }
   0xf   :  { %p135_p7 = pnand %p134_p6, %p128_p3 }
  0x11   :  { %138 = shalt.err (!%p135_p7)
}
  0x12   :  { %s213_s24 = smov 128   ;;  %s214_s25 = smov 8  }
  0x13   :  { %34 = dma.hbm_to_vmem [thread:$0]  %s302_s1, 512, %s29_s13, [#allocation6], %s213_s24, %s213_s24, %s214_s25  }
  0x14   :  { %s139_s30 = scalar_lea.hbm %s301_s0, 512 }
  0x15   :  { %p140_p8 = scmp.ne.s32.totalorder %s301_s0, %s139_s30  ;;  %p143_p9 = scmp.lt.u32.totalorder %s139_s30, %s301_s0 }
  0x17   :  { %p145_p10 = pnand %p143_p9, %p140_p8 }
  0x19   :  { %148 = shalt.err (!%p145_p10)
}
  0x1a   :  { %s149_s8 = scalar_lea.vmem %s237_s15, 512  ;;  %p154_p12 = scmp.lt.s32.totalorder %s237_s15, %s237_s15 }
  0x1b   :  { %p150_p11 = scmp.ne.s32.totalorder %s237_s15, %s149_s8  ;;  %p155_p13 = scmp.lt.s32.totalorder %s149_s8, %s149_s8 }
  0x1d   :  { %p156_p0 = por %p155_p13, %p154_p12 }
  0x1f   :  { %p157_p1 = pnand %p156_p0, %p150_p11 }
  0x21   :  { %160 = shalt.err (!%p157_p1)
}
  0x22   :  { %22 = dma.hbm_to_vmem [thread:$0]  %s301_s0, 512, %s237_s15, [#allocation3], %s213_s24, %s213_s24, %s214_s25  }
  0x23   :  { %s215_s10 = smov [#allocation7]   ;;  %s161_s14 = scalar_lea.hbm %s303_s2, 512 }
  0x24   :  { %s40_s11 = sshll.u32 %s215_s10, 4  ;;  %p162_p2 = scmp.ne.s32.totalorder %s303_s2, %s161_s14  ;;  %s41_s11 = int_to_ptr.vmem [resolvable:$true] %s40_s11 }
  0x25   :  { %p165_p3 = scmp.lt.u32.totalorder %s161_s14, %s303_s2 }
  0x27   :  { %p167_p4 = pnand %p165_p3, %p162_p2 }
  0x29   :  { %170 = shalt.err (!%p167_p4)
}
  0x2a   :  { %s171_s20 = scalar_lea.vmem %s41_s11, 512  ;;  %p176_p6 = scmp.lt.s32.totalorder %s41_s11, %s41_s11 }
  0x2b   :  { %p172_p5 = scmp.ne.s32.totalorder %s41_s11, %s171_s20  ;;  %p177_p7 = scmp.lt.s32.totalorder %s171_s20, %s171_s20 }
  0x2d   :  { %p178_p8 = por %p177_p7, %p176_p6 }
  0x2f   :  { %p179_p9 = pnand %p178_p8, %p172_p5 }
  0x31   :  { %182 = shalt.err (!%p179_p9)
}
  0x32   :  { %46 = dma.hbm_to_vmem [thread:$0]  %s303_s2, 512, %s41_s11, [#allocation6], %s213_s24, %s213_s24, %s214_s25  }
  0x33   :  { %205 = dma.done.wait [#allocation3], 512  }
  0x34   :  { %206 = vsyncadd [#allocation3], 4294966784 }
  0x35   :  { %207 = dma.done.wait [#allocation6], 1024  }
  0x36   :  { %208 = vsyncadd [#allocation6], 4294966272  ;;  %v56_v0 = vld [vmem:[#allocation2] sm:$0xff]  ;;  %v57_v1 = vld [vmem:[#allocation2 + $0x8] sm:$0xff]  ;;  %s216_s2 = smov [#allocation8]  }
  0x37   :  { %v58_v2 = vld [vmem:[#allocation2 + $0x10] sm:$0xff]  ;;  %v60_v3 = vld [vmem:[#allocation5] sm:$0xff]  ;;  %v61_v4 = vld [vmem:[#allocation5 + $0x8] sm:$0xff]  ;;  %s97_s21 = sshll.u32 %s216_s2, 4  ;;  %s98_s21 = int_to_ptr.vmem [resolvable:$true] %s97_s21 }
  0x38   :  { %v62_v5 = vld [vmem:[#allocation5 + $0x10] sm:$0xff]  ;;  %v63_v6 = vld [vmem:[#allocation5 + $0x18] sm:$0xff]  ;;  %v64_v7 = vld [vmem:[#allocation7] sm:$0xff]  ;;  %s183_s22 = scalar_lea.vmem %s98_s21, 16  ;;  %s187_s23 = scalar_lea.vmem %s98_s21, 32 }
  0x39   :  { %v65_v8 = vld [vmem:[#allocation7 + $0x8] sm:$0xff]  ;;  %v66_v9 = vld [vmem:[#allocation7 + $0x10] sm:$0xff]  ;;  %v67_v10 = vld [vmem:[#allocation7 + $0x18] sm:$0xff]  ;;  %v68_v11 = vsub.f32 %v60_v3, %v64_v7  ;;  %p184_p10 = scmp.ne.s32.totalorder %s98_s21, %s183_s22  ;;  %p188_p11 = scmp.lt.s32.totalorder %s98_s21, %s98_s21 }
  0x3a   :  { %v69_v12 = vsub.f32 %v61_v4, %v65_v8  ;;  %v70_v13 = vsub.f32 %v62_v5, %v66_v9  ;;  %v71_v14 = vsub.f32 %v63_v6, %v67_v10  ;;  %v59_v15 = vld [vmem:[#allocation2 + $0x18] sm:$0xff]  ;;  %p189_p12 = scmp.lt.s32.totalorder %s187_s23, %s183_s22 }
  0x3b   :  { %v72_v16 = vmul.f32 %v68_v11, %v56_v0 }
  0x3c   :  { %v73_v17 = vmul.f32 %v69_v12, %v57_v1  ;;  %v74_v18 = vmul.f32 %v70_v13, %v58_v2  ;;  %v75_v19 = vmul.f32 %v71_v14, %v59_v15  ;;  %p190_p13 = por %p189_p12, %p188_p11 }
  0x3e   :  { %v76_v20 = vadd.f32 %v73_v17, %v72_v16  ;;  %p191_p0 = pnand %p190_p13, %p184_p10 }
  0x40   :  { %v77_v21 = vadd.f32 %v76_v20, %v74_v18 }
  0x42   :  { %v78_v22 = vadd.f32 %v77_v21, %v75_v19 }
  0x44   :  { %v79_v23 = vrot.slane %v78_v22, 4 }
  0x46   :  { %v80_v24 = vadd.f32 %v79_v23, %v78_v22 }
  0x48   :  { %v81_v25 = vrot.slane %v80_v24, 2 }
  0x4a   :  { %v82_v26 = vadd.f32 %v81_v25, %v80_v24 }
  0x4c   :  { %v83_v27 = vrot.slane %v82_v26, 1 }
  0x4e   :  { %v84_v28 = vadd.f32 %v83_v27, %v82_v26 }
  0x50   :  { %v85_v29 = vsub.f32 0.0, %v84_v28 }
  0x52   :  { %v86_v30 = vmul.f32 1.442695, %v85_v29 }
  0x54   :  { %113 = vpow2.f32 %v86_v30 }
  0x5e   :  { %v114_v31 = vpop.eup %113 }
  0x5f   :  { %v88_v32 = vadd.f32 1.0, %v114_v31 }
  0x61   :  { %115 = vrcp.f32 %v88_v32 }
  0x6b   :  { %v116_v33 = vpop.eup %115 }
  0x6c   :  { %90 = vst [vmem:[#allocation8] sm:$0x1] %v116_v33 }
  0x6d   :  { %194 = shalt.err (!%p191_p0)
}
  0x6e   :  { %s195_s26 = scalar_lea.hbm %s304_s3, 16 }
  0x6f   :  { %p196_p1 = scmp.ne.s32.totalorder %s304_s3, %s195_s26  ;;  %p199_p2 = scmp.lt.u32.totalorder %s195_s26, %s304_s3 }
  0x71   :  { %p201_p3 = pnand %p199_p2, %p196_p1 }
  0x73   :  { %204 = shalt.err (!%p201_p3)
}
  0x74   :  { %100 = dma.vmem_to_hbm [thread:$0]  %s98_s21, 16, %s304_s3, [#allocation4]  }
  0x75   :  { %209 = dma.done.wait [#allocation4], 16  }
  0x76   :  { %210 = vsyncadd [#allocation4], 4294967280 }
  0x77   :  { %104 = vsyncpa [#allocation3], 1 }
  0x78   :  { %105 = vsyncpa [#allocation6], 1 }
  0x79   :  { %106 = vsyncpa [#allocation4], 1 }

</bundles_post_ra>
